<compile_context>
chip_gen: v5e
topology: v5e:2x2
jax: 0.10.0
libtpu: 0.0.40
codegen_flags: <defaults>
</compile_context>

<pallas_src>
import jax
import jax.numpy as jnp
from jax.experimental import pallas as pl
from jax.experimental.pallas import tpu as pltpu


def _round_up(a: int, b: int) -> int:
    return (a + b - 1) // b * b


def _vmem_capacity_bytes() -> int:
    """Physical VMEM per TensorCore (generation aware), with a safe fallback."""
    try:
        info = pltpu.get_tpu_info()
        for attr in ("vmem_capacity_bytes", "vmem_size_bytes", "vmem_bytes"):
            v = getattr(info, attr, None)
            if v:
                return int(v)
    except Exception:
        pass
    return 64 * 1024 * 1024  # conservative (v7x-sized) fallback


def _choose_tf(d_ff: int, target: int) -> int:
    """Lane-aligned d_ff chunk; prefer one that divides the 128-padded d_ff exactly."""
    f128 = _round_up(d_ff, 128)
    m = f128 // 128
    best = 128
    for d in range(1, m + 1):
        if m % d == 0 and 128 * d <= target:
            best = max(best, 128 * d)
    if best < min(target, f128) // 4:     # divisors force a tiny chunk -> accept some padding
        best = _round_up(min(target, f128), 128)
    return best


def _footprint_bytes(tm, tf, dm_pad, f_final, resident, cd_size) -> int:
    """Rough VMEM working set in bytes (x / out itemsize assumed 4 = worst case)."""
    if resident:
        weights = 2 * dm_pad * f_final * cd_size               # W1 + W2 fully resident
    else:
        weights = 2 * (dm_pad * tf + tf * dm_pad) * cd_size    # chunks, double-buffered
    tiles = (2 * tm * dm_pad * 4          # x tile, double-buffered
             + tm * dm_pad * cd_size      # in-kernel cast of the x tile
             + 2 * tm * dm_pad * 4        # out tile, double-buffered
             + tm * dm_pad * 4            # f32 accumulator scratch
             + tm * tf * (4 + cd_size)    # h (f32) + its compute-dtype cast
             + dm_pad * 4)                # folded bias
    return weights + tiles


def _plan(d_model: int, d_ff: int, compute_dtype) -> dict:
    """Tiling / residency plan; depends only on (d_model, d_ff, compute dtype, device)."""
    cd_size = jnp.dtype(compute_dtype).itemsize
    dm_pad = _round_up(d_model, 128)
    cap = _vmem_capacity_bytes()
    vmem_limit = min(int(cap * 0.78), cap - (12 << 20))   # ~100 MiB on v5e/v6e, ~50 MiB on v7x
    budget = int(vmem_limit * 0.9)                        # headroom for compiler scratch

    tf = _choose_tf(d_ff, target=1024)
    f_final = _round_up(_round_up(d_ff, 128), tf)

    # Resident iff the full weights plus a generous (tm=512) tile set fit the budget.
    resident = _footprint_bytes(512, tf, dm_pad, f_final, True, cd_size) <= budget
    if not resident:
        # Streaming path: shrink the chunk until a tm=512 working set fits (huge d_model).
        while tf > 128 and _footprint_bytes(512, tf, dm_pad, f_final, False, cd_size) > budget:
            tf = _choose_tf(d_ff, target=max(128, tf // 2))
            f_final = _round_up(_round_up(d_ff, 128), tf)
    # TODO(synk): for extremely large d_model the d_model contraction itself should be tiled
    #             (third grid axis); here dm_pad rides along untiled in each block.
    return dict(dm_pad=dm_pad, tf=tf, f_final=f_final, resident=resident,
                vmem_limit=int(vmem_limit), budget=budget, cd_size=cd_size)


def _choose_tm(n: int, plan: dict) -> int:
    """Token tile: as large as the VMEM budget allows, but >=2 tiles for megacore."""
    candidates = (512, 256, 128, 64, 32, 16) if plan["resident"] \
        else (1024, 512, 256, 128, 64, 32, 16)   # streamed weights: big tm = fewer weight passes
    for tm_t in candidates:
        tm = min(tm_t, _round_up(n, 16))
        if n >= 512 and _round_up(n, tm) // tm < 2:
            tm = _round_up((n + 1) // 2, 128)    # keep >=2 "parallel" tiles for v7x's 2 TCs
        tm = max(16, tm)
        if _footprint_bytes(tm, plan["tf"], plan["dm_pad"], plan["f_final"],
                            plan["resident"], plan["cd_size"]) <= plan["budget"]:
            return tm
    return 16


def _make_ffn_kernel(resident: bool, tf: int, compute_dtype):
    def kernel(x_ref, w1_ref, w2_ref, b2_ref, o_ref, acc_ref):
        k = pl.program_id(1)

        @pl.when(k == 0)
        def _init():
            # Both biases folded into the accumulator init (b2' = b1 @ W2 + b2, f32).
            acc_ref[...] = jnp.broadcast_to(b2_ref[...], acc_ref.shape)

        x_t = x_ref[...].astype(compute_dtype)        # cast in-kernel; no HBM copy of x
        if resident:
            off = pl.multiple_of(k * tf, 128)
            w1c = w1_ref[:, pl.ds(off, tf)]           # full weights resident in VMEM
            w2c = w2_ref[pl.ds(off, tf), :]
        else:
            w1c = w1_ref[...]                         # streamed, double-buffered chunk
            w2c = w2_ref[...]

        h = jnp.dot(x_t, w1c, preferred_element_type=jnp.float32)
        # TODO(synk): training-mode dropout on h would go here
        #             (pltpu.prng_seed + pltpu.stateful_bernoulli); eval mode = identity.
        acc_ref[...] += jnp.dot(h.astype(compute_dtype), w2c,
                                preferred_element_type=jnp.float32)

        @pl.when(k == pl.num_programs(1) - 1)
        def _store():
            o_ref[...] = acc_ref[...].astype(o_ref.dtype)

    return kernel


def prepare_ffn_params(w1, b1, w2, b2, *, compute_dtype=jnp.bfloat16):
    """One-time parameter prep (hoist out of the per-call path / cache across calls).

    w1: (d_model, d_ff), b1: (d_ff,) or (1, d_ff), w2: (d_ff, d_model), b2: (d_model,)/(1, d_model).
    Weights are stored transposed vs. torch.nn.Linear ((in, out) layout).
    """
    d_model, d_ff = w1.shape
    cd = jnp.dtype(w1.dtype) if compute_dtype is None else jnp.dtype(compute_dtype)
    plan = _plan(d_model, d_ff, cd)
    dm_pad, f_final = plan["dm_pad"], plan["f_final"]

    # Fold b1 into b2 (exact under eval-mode dropout): b2' = b1 @ W2 + b2  (f32, full precision).
    b2f = (jnp.dot(b1.reshape(1, d_ff).astype(jnp.float32),
                   w2.astype(jnp.float32),
                   precision=jax.lax.Precision.HIGHEST)
           + b2.reshape(1, d_model).astype(jnp.float32))

    w1p = w1.astype(cd)
    w2p = w2.astype(cd)
    if (dm_pad, f_final) != (d_model, d_ff):
        w1p = jnp.pad(w1p, ((0, dm_pad - d_model), (0, f_final - d_ff)))
        w2p = jnp.pad(w2p, ((0, f_final - d_ff), (0, dm_pad - d_model)))
    if dm_pad != d_model:
        b2f = jnp.pad(b2f, ((0, 0), (0, dm_pad - d_model)))

    return dict(w1=w1p, w2=w2p, b2=b2f, d_model=d_model, d_ff=d_ff, compute_dtype=cd)


def positionwise_feed_forward(x, params):
    """y = (x @ W1 + b1) @ W2 + b2 with x: (batch, seq, d_model)."""
    batch, seq, d_model = x.shape
    assert d_model == params["d_model"]
    d_ff = params["d_ff"]
    cd = params["compute_dtype"]
    out_dtype = x.dtype
    n = batch * seq

    plan = _plan(d_model, d_ff, cd)
    dm_pad, f_final, tf = plan["dm_pad"], plan["f_final"], plan["tf"]
    resident = plan["resident"]
    tm = _choose_tm(n, plan)
    n_pad = _round_up(n, tm)

    # x stays in its original dtype; pad only when the shape actually requires it.
    x2d = x.reshape(n, d_model)
    if (n_pad, dm_pad) != (n, d_model):
        x2d = jnp.pad(x2d, ((0, n_pad - n), (0, dm_pad - d_model)))

    grid = (n_pad // tm, f_final // tf)

    vmem_full = pl.BlockSpec(memory_space=pltpu.MemorySpace.VMEM)
    if resident:
        w1_spec, w2_spec = vmem_full, vmem_full                      # one DMA per call
    else:
        w1_spec = pl.BlockSpec((dm_pad, tf), lambda i, k: (0, k))    # W1 column chunk
        w2_spec = pl.BlockSpec((tf, dm_pad), lambda i, k: (k, 0))    # W2 row chunk

    weight_passes = 1 if resident else n_pad // tm
    nbytes = lambda a: a.size * a.dtype.itemsize
    cost = pl.CostEstimate(
        flops=4 * n_pad * dm_pad * f_final,
        transcendentals=0,
        bytes_accessed=int(nbytes(x2d)
                           + weight_passes * (nbytes(params["w1"]) + nbytes(params["w2"]))
                           + nbytes(params["b2"])
                           + n_pad * dm_pad * jnp.dtype(out_dtype).itemsize))

    out2d = pl.pallas_call(
        _make_ffn_kernel(resident, tf, cd),
        out_shape=jax.ShapeDtypeStruct((n_pad, dm_pad), out_dtype),
        grid_spec=pltpu.PrefetchScalarGridSpec(
            num_scalar_prefetch=0,
            grid=grid,
            in_specs=[
                pl.BlockSpec((tm, dm_pad), lambda i, k: (i, 0)),     # x token tile
                w1_spec,
                w2_spec,
                vmem_full,                                            # folded bias b2'
            ],
            out_specs=pl.BlockSpec((tm, dm_pad), lambda i, k: (i, 0)),
            scratch_shapes=[pltpu.VMEM((tm, dm_pad), jnp.float32)],
        ),
        compiler_params=pltpu.CompilerParams(
            dimension_semantics=("parallel", "arbitrary"),
            vmem_limit_bytes=plan["vmem_limit"],
        ),
        cost_estimate=cost,
    )(x2d, params["w1"], params["w2"], params["b2"])

    return out2d[:n, :d_model].reshape(batch, seq, d_model)


def init_params(key, d_model, d_ff, dtype=jnp.float32):
    """Deterministic init mirroring nn.Linear's U(-1/sqrt(fan_in), 1/sqrt(fan_in))."""
    k1, k2, k3, k4 = jax.random.split(key, 4)
    bound1 = 1.0 / (d_model ** 0.5)
    bound2 = 1.0 / (d_ff ** 0.5)
    # stored transposed vs torch: (in, out)
    w1 = jax.random.uniform(k1, (d_model, d_ff), dtype, -bound1, bound1)
    b1 = jax.random.uniform(k2, (1, d_ff), dtype, -bound1, bound1)
    w2 = jax.random.uniform(k3, (d_ff, d_model), dtype, -bound2, bound2)
    b2 = jax.random.uniform(k4, (1, d_model), dtype, -bound2, bound2)
    return w1, b1, w2, b2


if __name__ == "__main__":
    key = jax.random.PRNGKey(0)
    batch, seq, d_model, d_ff = 2, 8, 128, 256   # d_model >= 128 keeps stores lane-dense

    kx, kp = jax.random.split(key)
    x = jax.random.normal(kx, (batch, seq, d_model), jnp.float32)
    w1, b1, w2, b2 = init_params(kp, d_model, d_ff)

    # Plain-JAX reference (dropout = identity, eval mode).
    ref = (x.reshape(-1, d_model) @ w1 + b1) @ w2 + b2
    ref = ref.reshape(batch, seq, d_model)

    # f32 compute path — tight check.
    params32 = prepare_ffn_params(w1, b1, w2, b2, compute_dtype=jnp.float32)
    y32 = jax.block_until_ready(positionwise_feed_forward(x, params32))
    assert y32.shape == (batch, seq, d_model)
    assert jnp.allclose(y32, ref, atol=1e-3, rtol=1e-3), float(jnp.abs(y32 - ref).max())

    # bf16 MXU path (production default) — loose check vs f32 reference.
    paramsbf = prepare_ffn_params(w1, b1, w2, b2, compute_dtype=jnp.bfloat16)
    ybf = jax.block_until_ready(positionwise_feed_forward(x, paramsbf))
    assert ybf.shape == (batch, seq, d_model)
    assert jnp.allclose(ybf.astype(jnp.float32), ref, atol=5e-2, rtol=5e-2)

    print("KERNEL_OK")
</pallas_src>

<mosaic_0001>
module attributes {stable_mosaic.version = 11 : i64} {
  func.func @kernel(%arg0: i32, %arg1: i32, %arg2: memref<16x128xf32, #tpu.memory_space<vmem>>, %arg3: memref<128x256xf32, #tpu.memory_space<vmem>>, %arg4: memref<256x128xf32, #tpu.memory_space<vmem>>, %arg5: memref<1x128xf32, #tpu.memory_space<vmem>>, %arg6: memref<16x128xf32, #tpu.memory_space<vmem>>, %arg7: memref<16x128xf32, #tpu.memory_space<vmem>>) attributes {dimension_semantics = [#tpu.dimension_semantics<parallel>, #tpu.dimension_semantics<arbitrary>], iteration_bounds = array<i64: 1, 1>, scalar_prefetch = 0 : i64, scratch_operands = 1 : i64, tpu.core_type = #tpu.core_type<tc>, window_params = [{transform_indices = @transform_0, window_bounds = array<i64: 16, 128>}, {pipeline_mode = #tpu.pipeline_mode<synchronous>, transform_indices = @transform_1, window_bounds = array<i64: 128, 256>}, {pipeline_mode = #tpu.pipeline_mode<synchronous>, transform_indices = @transform_2, window_bounds = array<i64: 256, 128>}, {pipeline_mode = #tpu.pipeline_mode<synchronous>, transform_indices = @transform_3, window_bounds = array<i64: 1, 128>}, {transform_indices = @transform_4, window_bounds = array<i64: 16, 128>}]} {
    %c0_i32 = arith.constant 0 : i32
    %0 = arith.cmpi eq, %arg1, %c0_i32 : i32
    %1 = arith.extui %0 : i1 to i32
    %c0_i32_0 = arith.constant 0 : i32
    %2 = arith.cmpi ne, %1, %c0_i32_0 : i32
    scf.if %2 {
      %c0_11 = arith.constant 0 : index
      %c0_12 = arith.constant 0 : index
      %18 = vector.load %arg5[%c0_11, %c0_12] : memref<1x128xf32, #tpu.memory_space<vmem>>, vector<1x128xf32>
      %19 = vector.shape_cast %18 : vector<1x128xf32> to vector<1x128xf32>
      %20 = vector.broadcast %19 : vector<1x128xf32> to vector<16x128xf32>
      %c0_13 = arith.constant 0 : index
      %c0_14 = arith.constant 0 : index
      %21 = vector.load %arg7[%c0_13, %c0_14] : memref<16x128xf32, #tpu.memory_space<vmem>>, vector<16x128xf32>
      tpu.vector_store %arg7[%c0_13, %c0_14], %20 {strides = array<i32>} : memref<16x128xf32, #tpu.memory_space<vmem>>, vector<16x128xf32>,
    } else {
    }
    %c0 = arith.constant 0 : index
    %c0_1 = arith.constant 0 : index
    %3 = vector.load %arg2[%c0, %c0_1] : memref<16x128xf32, #tpu.memory_space<vmem>>, vector<16x128xf32>
    %c256_i32 = arith.constant 256 : i32
    %4 = arith.muli %arg1, %c256_i32 : i32
    %5 = tpu.assume_multiple %4, 128 : i32
    %c0_2 = arith.constant 0 : index
    %6 = arith.index_cast %5 : i32 to index
    %7 = vector.load %arg3[%c0_2, %6] : memref<128x256xf32, #tpu.memory_space<vmem>>, vector<128x256xf32>
    %8 = arith.index_cast %5 : i32 to index
    %c0_3 = arith.constant 0 : index
    %9 = vector.load %arg4[%8, %c0_3] : memref<256x128xf32, #tpu.memory_space<vmem>>, vector<256x128xf32>
    %cst = arith.constant dense<0.000000e+00> : vector<16x256xf32>
    %10 = tpu.matmul %3, %7, %cst {dimension_numbers = #tpu.dot_dimension_numbers<[1], [0], [0], [1], [0, 0, 1, 1], [], []>} : vector<16x128xf32>, vector<128x256xf32>, vector<16x256xf32> -> vector<16x256xf32>
    %c0_4 = arith.constant 0 : index
    %c0_5 = arith.constant 0 : index
    %11 = vector.load %arg7[%c0_4, %c0_5] : memref<16x128xf32, #tpu.memory_space<vmem>>, vector<16x128xf32>
    %cst_6 = arith.constant dense<0.000000e+00> : vector<16x128xf32>
    %12 = tpu.matmul %10, %9, %cst_6 {dimension_numbers = #tpu.dot_dimension_numbers<[1], [0], [0], [1], [0, 0, 1, 1], [], []>} : vector<16x256xf32>, vector<256x128xf32>, vector<16x128xf32> -> vector<16x128xf32>
    %13 = arith.addf %11, %12 : vector<16x128xf32>
    %c0_7 = arith.constant 0 : index
    %c0_8 = arith.constant 0 : index
    %14 = vector.load %arg7[%c0_7, %c0_8] : memref<16x128xf32, #tpu.memory_space<vmem>>, vector<16x128xf32>
    tpu.vector_store %arg7[%c0_7, %c0_8], %13 {strides = array<i32>} : memref<16x128xf32, #tpu.memory_space<vmem>>, vector<16x128xf32>,
    %c0_i32_9 = arith.constant 0 : i32
    %15 = arith.cmpi eq, %arg1, %c0_i32_9 : i32
    %16 = arith.extui %15 : i1 to i32
    %c0_i32_10 = arith.constant 0 : i32
    %17 = arith.cmpi ne, %16, %c0_i32_10 : i32
    scf.if %17 {
      %c0_11 = arith.constant 0 : index
      %c0_12 = arith.constant 0 : index
      %18 = vector.load %arg7[%c0_11, %c0_12] : memref<16x128xf32, #tpu.memory_space<vmem>>, vector<16x128xf32>
      %c0_13 = arith.constant 0 : index
      %c0_14 = arith.constant 0 : index
      %19 = vector.load %arg6[%c0_13, %c0_14] : memref<16x128xf32, #tpu.memory_space<vmem>>, vector<16x128xf32>
      tpu.vector_store %arg6[%c0_13, %c0_14], %18 {strides = array<i32>} : memref<16x128xf32, #tpu.memory_space<vmem>>, vector<16x128xf32>,
    } else {
    }
    return
  }
  func.func @transform_0(%arg0: i32, %arg1: i32) -> (i32, i32) {
    %c0_i32 = arith.constant 0 : i32
    %c0_i32_0 = arith.constant 0 : i32
    return %arg0, %c0_i32 : i32, i32
  }
  func.func @transform_1(%arg0: i32, %arg1: i32) -> (i32, i32) {
    %c0_i32 = arith.constant 0 : i32
    %c0_i32_0 = arith.constant 0 : i32
    %c0_i32_1 = arith.constant 0 : i32
    return %c0_i32, %c0_i32_0 : i32, i32
  }
  func.func @transform_2(%arg0: i32, %arg1: i32) -> (i32, i32) {
    %c0_i32 = arith.constant 0 : i32
    %c0_i32_0 = arith.constant 0 : i32
    %c0_i32_1 = arith.constant 0 : i32
    return %c0_i32, %c0_i32_0 : i32, i32
  }
  func.func @transform_3(%arg0: i32, %arg1: i32) -> (i32, i32) {
    %c0_i32 = arith.constant 0 : i32
    %c0_i32_0 = arith.constant 0 : i32
    %c0_i32_1 = arith.constant 0 : i32
    return %c0_i32, %c0_i32_0 : i32, i32
  }
  func.func @transform_4(%arg0: i32, %arg1: i32) -> (i32, i32) {
    %c0_i32 = arith.constant 0 : i32
    %c0_i32_0 = arith.constant 0 : i32
    return %arg0, %c0_i32 : i32, i32
  }
}

</mosaic_0001>

<bundles_post_ra>
// kernel: tpu_custom_call.1
= control target key start
LH: loop header
LB: loop body
LE: loop exit
PB: predicated region body
PF: predicated region fallthrough
CT: control target
= control target key end

     0   :  { %9 = vsyncpa [#allocation4], 0  ;;  %s442_s0 = inlined_call_operand.hbm [shape: f32[16,128], index: 0, kind: input, shape index: {}]   ;;  %s443_s1 = inlined_call_operand.hbm [shape: f32[128,256], index: 1, kind: input, shape index: {}]   ;;  %s444_s2 = inlined_call_operand.hbm [shape: f32[256,128], index: 2, kind: input, shape index: {}]   ;;  %s445_s3 = inlined_call_operand.vmem [shape: f32[1,128], index: 3, kind: input, shape index: {}]   ;;  %s446_s4 = inlined_call_operand.hbm [shape: f32[16,128], index: 4, kind: output, shape index: {}]  }
   0x1   :  { %10 = vsyncpa [#allocation7], 0  ;;  %s29_s17 = sshll.u32 %s443_s1, 4  ;;  %s30_s17 = int_to_ptr.hbm [resolvable:$true] %s29_s17 }
   0x2   :  { %11 = vsyncpa [#allocation5], 0  ;;  %s385_s18 = smov [#allocation6]   ;;  %s16_s22 = sshll.u32 %s442_s0, 4  ;;  %s17_s22 = int_to_ptr.hbm [resolvable:$true] %s16_s22 }
   0x3   :  { %s31_s19 = sshll.u32 %s385_s18, 4  ;;  %s386_s23 = smov 256   ;;  %s32_s19 = int_to_ptr.vmem [resolvable:$true] %s31_s19 }
   0x4   :  { %s387_s24 = smov 16   ;;  %s388_s25 = smov [#allocation3]  }
   0x5   :  { %37 = dma.hbm_to_vmem [thread:$0]  %s30_s17, 4096, %s32_s19, [#allocation7], %s386_s23, %s386_s23, %s387_s24  }
   0x6   :  { %s18_s26 = sshll.u32 %s388_s25, 4  ;;  %s389_s27 = smov 128   ;;  %s19_s26 = int_to_ptr.vmem [resolvable:$true] %s18_s26 }
   0x7   :  { %s390_s28 = smov 8   ;;  %s42_s30 = sshll.u32 %s444_s2, 4  ;;  %s43_s30 = int_to_ptr.hbm [resolvable:$true] %s42_s30 }
   0x8   :  { %24 = dma.hbm_to_vmem [thread:$0]  %s17_s22, 256, %s19_s26, [#allocation4], %s389_s27, %s389_s27, %s390_s28  }
   0x9   :  { %s391_s5 = smov [#allocation8]  }
   0xa   :  { %s44_s0 = sshll.u32 %s391_s5, 4  ;;  %s45_s0 = int_to_ptr.vmem [resolvable:$true] %s44_s0 }
   0xb   :  { %50 = dma.hbm_to_vmem [thread:$0]  %s43_s30, 4096, %s45_s0, [#allocation7], %s389_s27, %s389_s27, %s390_s28  }
   0xc   :  { %379 = dma.done.wait [#allocation4], 256  }
   0xd   :  { %380 = vsyncadd [#allocation4], 4294967040 }
   0xe   :  { %381 = dma.done.wait [#allocation7], 8192  }
   0xf   :  { %382 = vsyncadd [#allocation7], 4294959104  ;;  %v112_v0 = vld [vmem:[#allocation6 + $0xf0] sm:$0xff]  ;;  %v113_v1 = vld [vmem:[#allocation6 + $0xf8] sm:$0xff]  ;;  %s392_s7 = smov [#allocation9]   ;;  %s258_s11 = sshll.u32 %s446_s4, 4  ;;  %s259_s11 = int_to_ptr.hbm [resolvable:$true] %s258_s11 }
  0x10   :  { %v110_v2 = vld [vmem:[#allocation6 + $0xe0] sm:$0xff]  ;;  %147 = vmatpush.msra.mxu0 %v112_v0  ;;  %170 = vmatpush.msra.mxu1 %v113_v1  ;;  %v111_v3 = vld [vmem:[#allocation6 + $0xe8] sm:$0xff]  ;;  %v108_v4 = vld [vmem:[#allocation6 + $0xd0] sm:$0xff]  ;;  %s256_s8 = sshll.u32 %s392_s7, 4  ;;  %s257_s8 = int_to_ptr.vmem [resolvable:$true] %s256_s8 }
  0x11   :  { %v109_v5 = vld [vmem:[#allocation6 + $0xd8] sm:$0xff]  ;;  %v106_v6 = vld [vmem:[#allocation6 + $0xc0] sm:$0xff]  ;;  %v107_v7 = vld [vmem:[#allocation6 + $0xc8] sm:$0xff] }
  0x12   :  { %148 = vmatpush.msra.mxu0 %v110_v2  ;;  %171 = vmatpush.msra.mxu1 %v111_v3  ;;  %v104_v8 = vld [vmem:[#allocation6 + $0xb0] sm:$0xff]  ;;  %v105_v9 = vld [vmem:[#allocation6 + $0xb8] sm:$0xff]  ;;  %v102_v10 = vld [vmem:[#allocation6 + $0xa0] sm:$0xff] }
  0x13   :  { %v103_v11 = vld [vmem:[#allocation6 + $0xa8] sm:$0xff]  ;;  %v100_v12 = vld [vmem:[#allocation6 + $0x90] sm:$0xff]  ;;  %v101_v13 = vld [vmem:[#allocation6 + $0x98] sm:$0xff] }
  0x14   :  { %149 = vmatpush.msra.mxu0 %v108_v4  ;;  %172 = vmatpush.msra.mxu1 %v109_v5  ;;  %v98_v14 = vld [vmem:[#allocation6 + $0x80] sm:$0xff]  ;;  %v130_v15 = vld [vmem:[#allocation8 + $0x78] sm:$0xff]  ;;  %v99_v17 = vld [vmem:[#allocation6 + $0x88] sm:$0xff] }
  0x15   :  { %v146_v16 = vld [vmem:[#allocation8 + $0xf8] sm:$0xff]  ;;  %195 = vmatpush.msra.mxu2 %v130_v15  ;;  %v129_v18 = vld [vmem:[#allocation8 + $0x70] sm:$0xff]  ;;  %v128_v20 = vld [vmem:[#allocation8 + $0x68] sm:$0xff] }
  0x16   :  { %150 = vmatpush.msra.mxu0 %v106_v6  ;;  %173 = vmatpush.msra.mxu1 %v107_v7  ;;  %v145_v19 = vld [vmem:[#allocation8 + $0xf0] sm:$0xff]  ;;  %v144_v21 = vld [vmem:[#allocation8 + $0xe8] sm:$0xff]  ;;  %v97_v23 = vld [vmem:[#allocation6 + $0x78] sm:$0xff] }
  0x17   :  { %218 = vmatpush.msra.mxu3 %v146_v16  ;;  %v96_v22 = vld [vmem:[#allocation6 + $0x70] sm:$0xff]  ;;  %196 = vmatpush.msra.mxu2 %v129_v18  ;;  %v127_v24 = vld [vmem:[#allocation8 + $0x60] sm:$0xff]  ;;  %v95_v27 = vld [vmem:[#allocation6 + $0x68] sm:$0xff] }
  0x18   :  { %151 = vmatpush.msra.mxu0 %v104_v8  ;;  %174 = vmatpush.msra.mxu1 %v105_v9  ;;  %v143_v25 = vld [vmem:[#allocation8 + $0xe0] sm:$0xff]  ;;  %v126_v28 = vld [vmem:[#allocation8 + $0x58] sm:$0xff]  ;;  %v92_v30 = vld [vmem:[#allocation6 + $0x50] sm:$0xff] }
  0x19   :  { %219 = vmatpush.msra.mxu3 %v145_v19  ;;  %v94_v26 = vld [vmem:[#allocation6 + $0x60] sm:$0xff]  ;;  %197 = vmatpush.msra.mxu2 %v128_v20  ;;  %v142_v29 = vld [vmem:[#allocation8 + $0xd8] sm:$0xff]  ;;  %v125_v32 = vld [vmem:[#allocation8 + $0x50] sm:$0xff] }
  0x1a   :  { %152 = vmatpush.msra.mxu0 %v102_v10  ;;  %175 = vmatpush.msra.mxu1 %v103_v11  ;;  %v93_v31 = vld [vmem:[#allocation6 + $0x58] sm:$0xff]  ;;  %v141_v33 = vld [vmem:[#allocation8 + $0xd0] sm:$0xff]  ;;  %v90_v34 = vld [vmem:[#allocation6 + $0x40] sm:$0xff] }
  0x1b   :  { %220 = vmatpush.msra.mxu3 %v144_v21  ;;  %198 = vmatpush.msra.mxu2 %v127_v24  ;;  %v91_v35 = vld [vmem:[#allocation6 + $0x48] sm:$0xff]  ;;  %v88_v38 = vld [vmem:[#allocation6 + $0x30] sm:$0xff]  ;;  %v89_v39 = vld [vmem:[#allocation6 + $0x38] sm:$0xff] }
  0x1c   :  { %153 = vmatpush.msra.mxu0 %v100_v12  ;;  %176 = vmatpush.msra.mxu1 %v101_v13  ;;  %v124_v36 = vld [vmem:[#allocation8 + $0x48] sm:$0xff]  ;;  %v123_v40 = vld [vmem:[#allocation8 + $0x40] sm:$0xff]  ;;  %v122_v44 = vld [vmem:[#allocation8 + $0x38] sm:$0xff] }
  0x1d   :  { %221 = vmatpush.msra.mxu3 %v143_v25  ;;  %199 = vmatpush.msra.mxu2 %v126_v28  ;;  %v140_v37 = vld [vmem:[#allocation8 + $0xc8] sm:$0xff]  ;;  %v139_v41 = vld [vmem:[#allocation8 + $0xc0] sm:$0xff]  ;;  %v138_v45 = vld [vmem:[#allocation8 + $0xb8] sm:$0xff] }
  0x1e   :  { %154 = vmatpush.msra.mxu0 %v98_v14  ;;  %177 = vmatpush.msra.mxu1 %v99_v17  ;;  %v86_v42 = vld [vmem:[#allocation6 + $0x20] sm:$0xff]  ;;  %v87_v43 = vld [vmem:[#allocation6 + $0x28] sm:$0xff]  ;;  %v84_v46 = vld [vmem:[#allocation6 + $0x10] sm:$0xff] }
  0x1f   :  { %222 = vmatpush.msra.mxu3 %v142_v29  ;;  %200 = vmatpush.msra.mxu2 %v125_v32  ;;  %v85_v47 = vld [vmem:[#allocation6 + $0x18] sm:$0xff]  ;;  %v121_v48 = vld [vmem:[#allocation8 + $0x30] sm:$0xff]  ;;  %v82_v50 = vld [vmem:[#allocation6] sm:$0xff] }
  0x20   :  { %155 = vmatpush.msra.mxu0 %v96_v22  ;;  %178 = vmatpush.msra.mxu1 %v97_v23  ;;  %v137_v49 = vld [vmem:[#allocation8 + $0xb0] sm:$0xff]  ;;  %v83_v51 = vld [vmem:[#allocation6 + $0x8] sm:$0xff]  ;;  %v119_v55 = vld [vmem:[#allocation8 + $0x20] sm:$0xff] }
  0x21   :  { %223 = vmatpush.msra.mxu3 %v141_v33  ;;  %201 = vmatpush.msra.mxu2 %v124_v36  ;;  %v75_v52 = vld [vmem:[#allocation3] sm:$0xff]  ;;  %v120_v53 = vld [vmem:[#allocation8 + $0x28] sm:$0xff]  ;;  %v135_v56 = vld [vmem:[#allocation8 + $0xa0] sm:$0xff] }
  0x22   :  { %156 = vmatpush.msra.mxu0 %v94_v26  ;;  %179 = vmatpush.msra.mxu1 %v95_v27  ;;  %v136_v54 = vld [vmem:[#allocation8 + $0xa8] sm:$0xff]  ;;  %v118_v57 = vld [vmem:[#allocation8 + $0x18] sm:$0xff]  ;;  %v117_v59 = vld [vmem:[#allocation8 + $0x10] sm:$0xff] }
  0x23   :  { %224 = vmatpush.msra.mxu3 %v140_v37  ;;  %202 = vmatpush.msra.mxu2 %v123_v40  ;;  %v134_v58 = vld [vmem:[#allocation8 + $0x98] sm:$0xff]  ;;  %v133_v60 = vld [vmem:[#allocation8 + $0x90] sm:$0xff]  ;;  %v116_v62 = vld [vmem:[#allocation8 + $0x8] sm:$0xff] }
  0x24   :  { %157 = vmatpush.msra.mxu0 %v92_v30  ;;  %180 = vmatpush.msra.mxu1 %v93_v31  ;;  %v76_v61 = vld [vmem:[#allocation3 + $0x8] sm:$0xff]  ;;  %v132_v63 = vld [vmem:[#allocation8 + $0x88] sm:$0xff]  ;;  %v115_v0 = vld [vmem:[#allocation8] sm:$0xff] }
  0x25   :  { %225 = vmatpush.msra.mxu3 %v139_v41  ;;  %203 = vmatpush.msra.mxu2 %v122_v44  ;;  %v131_v1 = vld [vmem:[#allocation8 + $0x80] sm:$0xff]  ;;  %v282_v6 = vld [vmem:[%s445_s3] ss:$0 sm:$0xff] }
  0x26   :  { %158 = vmatpush.msra.mxu0 %v90_v34  ;;  %181 = vmatpush.msra.mxu1 %v91_v35 }
  0x27   :  { %226 = vmatpush.msra.mxu3 %v138_v45  ;;  %204 = vmatpush.msra.mxu2 %v121_v48 }
  0x28   :  { %159 = vmatpush.msra.mxu0 %v88_v38  ;;  %182 = vmatpush.msra.mxu1 %v89_v39 }
  0x29   :  { %227 = vmatpush.msra.mxu3 %v137_v49  ;;  %205 = vmatpush.msra.mxu2 %v120_v53 }
  0x2a   :  { %160 = vmatpush.msra.mxu0 %v86_v42  ;;  %183 = vmatpush.msra.mxu1 %v87_v43 }
  0x2b   :  { %228 = vmatpush.msra.mxu3 %v136_v54  ;;  %206 = vmatpush.msra.mxu2 %v119_v55 }
  0x2c   :  { %161 = vmatpush.msra.mxu0 %v84_v46  ;;  %184 = vmatpush.msra.mxu1 %v85_v47 }
  0x2d   :  { %229 = vmatpush.msra.mxu3 %v135_v56  ;;  %207 = vmatpush.msra.mxu2 %v118_v57 }
  0x2e   :  { %162 = vmatpush.msra.mxu0 %v82_v50  ;;  %185 = vmatpush.msra.mxu1 %v83_v51 }
  0x2f   :  { %163 = vmatmul.f32.vlgmr.msra.gmra.mxu0 %v75_v52  ;;  %186 = vmatmul.f32.vlgmr.msra.gmra.mxu1 %v75_v52 }
  0x30   :  { %230 = vmatpush.msra.mxu3 %v134_v58  ;;  %208 = vmatpush.msra.mxu2 %v117_v59 }
  0x32   :  { %231 = vmatpush.msra.mxu3 %v133_v60  ;;  %209 = vmatpush.msra.mxu2 %v116_v62 }
  0x34   :  { %232 = vmatpush.msra.mxu3 %v132_v63  ;;  %210 = vmatpush.msra.mxu2 %v115_v0 }
  0x36   :  { %233 = vmatpush.msra.mxu3 %v131_v1 }
  0x37   :  { %166 = vmatmul.f32.gmra.mxu0 %v76_v61  ;;  %189 = vmatmul.f32.gmra.mxu1 %v76_v61 }
  0xac   :  { %v164_v2 = vpop.f32.mrf.mxu0  ;;  %v187_v3 = vpop.f32.mrf.mxu1 }
  0xad   :  { %211 = vmatmul.f32.vlgmr.msra.gmra.mxu2 %v164_v2  ;;  %234 = vmatmul.f32.vlgmr.msra.gmra.mxu3 %v187_v3 }
  0xb4   :  { %v167_v4 = vpop.f32.mrf.mxu0  ;;  %v190_v5 = vpop.f32.mrf.mxu1 }
  0xb5   :  { %214 = vmatmul.f32.gmra.mxu2 %v167_v4  ;;  %237 = vmatmul.f32.gmra.mxu3 %v190_v5 }
 0x130   :  { %v212_v7 = vpop.f32.mrf.mxu2  ;;  %v235_v8 = vpop.f32.mrf.mxu3 }
 0x131   :  { %v236_v9 = vadd.f32 %v235_v8, %v212_v7 }
 0x133   :  { %v241_v10 = vadd.f32 %v282_v6, %v236_v9 }
 0x135   :  { %250 = vst [vmem:[#allocation9] sm:$0xff] %v241_v10 }
 0x138   :  { %v215_v11 = vpop.f32.mrf.mxu2  ;;  %v238_v12 = vpop.f32.mrf.mxu3 }
 0x139   :  { %v239_v13 = vadd.f32 %v238_v12, %v215_v11 }
 0x13b   :  { %v242_v14 = vadd.f32 %v282_v6, %v239_v13 }
 0x13d   :  { %251 = vst [vmem:[#allocation9 + $0x8] sm:$0xff] %v242_v14 }
 0x13e   :  { %264 = dma.vmem_to_hbm [thread:$0]  %s257_s8, 256, %s259_s11, [#allocation5], %s389_s27, %s389_s27, %s390_s28  }
 0x13f   :  { %383 = dma.done.wait [#allocation5], 256  }
 0x140   :  { %384 = vsyncadd [#allocation5], 4294967040 }
 0x141   :  { %269 = vsyncpa [#allocation4], 1 }
 0x142   :  { %270 = vsyncpa [#allocation7], 1 }
 0x143   :  { %271 = vsyncpa [#allocation5], 1 }

</bundles_post_ra>
